<compile_context>
chip_gen: v5e
topology: v5e:2x2
jax: 0.10.0
libtpu: 0.0.40
codegen_flags: <defaults>
</compile_context>

<pallas_src>
import functools

import jax
import jax.numpy as jnp
from jax.experimental import pallas as pl
from jax.experimental.pallas import tpu as pltpu


def _round_up(x, m):
    return ((x + m - 1) // m) * m


def _late_fusion_kernel(x_ref, w_ref, b_ref, o_ref, acc_ref, *, inv_m):
    """Grid = (batch_tiles, M). Accumulate sum_m x_m @ W_m over the M axis.

    x_ref: (1, tb, D)        activations for modality m, batch tile i
    w_ref: (1, D, C_pad)     pre-transposed classifier weights for modality m
    b_ref: (1, C_pad)        pre-summed, pre-scaled (by 1/M) f32 bias row
    o_ref: (tb, C_pad)       output tile
    acc_ref: (tb, C_pad) f32 accumulator scratch
    """
    m = pl.program_id(1)

    @pl.when(m == 0)
    def _():
        acc_ref[...] = jnp.zeros_like(acc_ref)

    acc_ref[...] += jnp.dot(
        x_ref[0], w_ref[0], preferred_element_type=jnp.float32
    )

    @pl.when(m == pl.num_programs(1) - 1)
    def _():
        # Epilogue in f32 (safe on v5e, which has no bf16 VPU path).
        o_ref[...] = (acc_ref[...] * inv_m + b_ref[...]).astype(o_ref.dtype)


def late_fusion(inputs_stacked, weights, biases):
    """Fused LateFusion forward.

    inputs_stacked: (M, B, D)  -- the M inputs that are actually paired with classifiers
    weights:        (M, C, D)  -- the M paired nn.Linear weights (out_features=C)
    biases:         (M, C)
    returns:        (B, C) = (sum_m inputs[m] @ weights[m].T + biases[m]) / M

    The divisor is M, the number of *paired* inputs. Use `late_fusion_module` below to
    reproduce PyTorch's zip-truncation (M = min(len(inputs), num_classes)).
    """
    M, B, D = inputs_stacked.shape
    Mw, C, Dw = weights.shape
    assert Mw == M and Dw == D and biases.shape == (M, C), "mismatched classifier shapes"

    inv_m = 1.0 / M
    out_dtype = jnp.result_type(inputs_stacked.dtype, weights.dtype)

    # ---- wrapper-side re-layout of the SMALL tensors only (X is untouched) ----
    C_pad = _round_up(C, 128)                                   # lane-dense output
    w_t = jnp.transpose(weights, (0, 2, 1))                     # (M, D, C)
    if C_pad != C:
        w_t = jnp.pad(w_t, ((0, 0), (0, 0), (0, C_pad - C)))    # (M, D, C_pad)
    b_sum = jnp.sum(biases.astype(jnp.float32), axis=0) * inv_m  # (C,), pre-scaled
    if C_pad != C:
        b_sum = jnp.pad(b_sum, (0, C_pad - C))
    b_p = b_sum.reshape(1, C_pad)

    # ---- batch tile selection ----
    x_item = jnp.dtype(inputs_stacked.dtype).itemsize
    sub = max(8, 32 // x_item)          # sublane packing: 8 (f32), 16 (bf16), 32 (int8/fp8)

    if B > 512:
        tb = 512
    elif B >= 64:
        # aim for >= 2 batch tiles so both v7x TensorCores get work
        tb = _round_up(-(-B // 2), sub)
    else:
        tb = B                          # full-dim block: no (8,128) requirement

    # keep the X block under ~6 MiB so double-buffering fits every scoped-VMEM default
    x_block_budget = 6 * 1024 * 1024
    max_tb = max(sub, (x_block_budget // max(1, D * x_item)) // sub * sub)
    if tb > max_tb:
        tb = max_tb

    grid = (pl.cdiv(B, tb), M)          # reduction axis (M) last, by convention

    w_item = jnp.dtype(w_t.dtype).itemsize
    o_item = jnp.dtype(out_dtype).itemsize
    cost = pl.CostEstimate(
        flops=2 * M * B * D * C_pad,
        transcendentals=0,
        bytes_accessed=(M * B * D * x_item
                        + M * D * C_pad * w_item
                        + C_pad * 4
                        + B * C_pad * o_item),
    )

    out_padded = pl.pallas_call(
        functools.partial(_late_fusion_kernel, inv_m=inv_m),
        out_shape=jax.ShapeDtypeStruct((B, C_pad), out_dtype),
        grid_spec=pltpu.PrefetchScalarGridSpec(
            num_scalar_prefetch=0,
            grid=grid,
            in_specs=[
                # activations read straight from the original (M, B, D) layout
                pl.BlockSpec((1, tb, D), lambda i, m: (m, i, 0)),
                # pre-transposed weights (M, D, C_pad)
                pl.BlockSpec((1, D, C_pad), lambda i, m: (m, 0, 0)),
                # pre-summed bias row, constant block index -> fetched once
                pl.BlockSpec((1, C_pad), lambda i, m: (0, 0)),
            ],
            out_specs=pl.BlockSpec((tb, C_pad), lambda i, m: (i, 0)),
            scratch_shapes=[pltpu.VMEM((tb, C_pad), jnp.float32)],
        ),
        compiler_params=pltpu.CompilerParams(
            dimension_semantics=("parallel", "arbitrary"),
        ),
        cost_estimate=cost,
    )(inputs_stacked, w_t, b_p)

    return out_padded[:, :C]


def late_fusion_module(inputs_list, weights_all, biases_all):
    """Faithful LateFusion.forward: zip(inputs, classifiers) truncates to min length."""
    num_classes = weights_all.shape[0]
    # check_input_dimensions: all inputs share the feature dim of inputs[0]
    d = inputs_list[0].shape[-1]
    for i, inp in enumerate(inputs_list):
        if inp.shape[-1] != d:
            raise ValueError(
                f"Input tensor at index {i} has shape {inp.shape[-1]}, but expected {d}. "
                "Ensure projectors output consistent dimensions."
            )
    m = min(len(inputs_list), num_classes)          # == len(logits) in the PyTorch module
    x = jnp.stack(inputs_list[:m], axis=0)          # (m, B, D)
    return late_fusion(x, weights_all[:m], biases_all[:m])


if __name__ == "__main__":
    # Shapes consistent with the module: num_classes classifiers
    # (nn.Linear(input_dim, num_classes)), one input per classifier.
    batch = 96
    input_dim = 32
    num_classes = 4
    num_inputs = num_classes

    key = jax.random.PRNGKey(0)
    kx, kw, kb, kx2, kw2, kb2 = jax.random.split(key, 6)

    inputs = jax.random.normal(kx, (num_inputs, batch, input_dim), dtype=jnp.float32)
    weights = 0.1 * jax.random.normal(kw, (num_classes, num_classes, input_dim), dtype=jnp.float32)
    biases = 0.1 * jax.random.normal(kb, (num_classes, num_classes), dtype=jnp.float32)

    out = late_fusion_module([inputs[i] for i in range(num_inputs)], weights, biases)
    out = jax.block_until_ready(out)

    m = min(num_inputs, num_classes)
    ref = sum(inputs[i] @ weights[i].T + biases[i] for i in range(m)) / m
    assert out.shape == (batch, num_classes)
    assert jnp.allclose(out, ref, atol=1e-5, rtol=1e-5), float(jnp.max(jnp.abs(out - ref)))

    # Second check: non-aligned shapes + zip truncation (5 inputs, 6 classifiers) to
    # exercise the C-padding, full-dim (non-128) feature contraction, and single-tile
    # batch paths.
    B2, D2, C2, M2 = 24, 40, 6, 5
    xs2 = jax.random.normal(kx2, (M2, B2, D2), dtype=jnp.float32)
    w2 = 0.1 * jax.random.normal(kw2, (C2, C2, D2), dtype=jnp.float32)
    b2 = 0.1 * jax.random.normal(kb2, (C2, C2), dtype=jnp.float32)
    out2 = jax.block_until_ready(
        late_fusion_module([xs2[i] for i in range(M2)], w2, b2)
    )
    ref2 = sum(xs2[i] @ w2[i].T + b2[i] for i in range(M2)) / M2
    assert out2.shape == (B2, C2)
    assert jnp.allclose(out2, ref2, atol=1e-5, rtol=1e-5), float(jnp.max(jnp.abs(out2 - ref2)))

    print("KERNEL_OK")
</pallas_src>

<mosaic_0001>
module attributes {stable_mosaic.version = 11 : i64} {
  func.func @_late_fusion_kernel(%arg0: i32, %arg1: i32, %arg2: memref<1x48x32xf32, #tpu.memory_space<vmem>>, %arg3: memref<1x32x128xf32, #tpu.memory_space<vmem>>, %arg4: memref<1x128xf32, #tpu.memory_space<vmem>>, %arg5: memref<48x128xf32, #tpu.memory_space<vmem>>, %arg6: memref<48x128xf32, #tpu.memory_space<vmem>>) attributes {dimension_semantics = [#tpu.dimension_semantics<parallel>, #tpu.dimension_semantics<arbitrary>], iteration_bounds = array<i64: 2, 4>, scalar_prefetch = 0 : i64, scratch_operands = 1 : i64, tpu.core_type = #tpu.core_type<tc>, window_params = [{transform_indices = @transform_0, window_bounds = array<i64: 1, 48, 32>}, {transform_indices = @transform_1, window_bounds = array<i64: 1, 32, 128>}, {pipeline_mode = #tpu.pipeline_mode<synchronous>, transform_indices = @transform_2, window_bounds = array<i64: 1, 128>}, {transform_indices = @transform_3, window_bounds = array<i64: 48, 128>}]} {
    %c0_i32 = arith.constant 0 : i32
    %0 = arith.cmpi eq, %arg1, %c0_i32 : i32
    %1 = arith.extui %0 : i1 to i32
    %c0_i32_0 = arith.constant 0 : i32
    %2 = arith.cmpi ne, %1, %c0_i32_0 : i32
    scf.if %2 {
      %cst_11 = arith.constant 0.000000e+00 : f32
      %14 = vector.broadcast %cst_11 : f32 to vector<48x128xf32>
      %c0_12 = arith.constant 0 : index
      %c0_13 = arith.constant 0 : index
      %15 = vector.load %arg6[%c0_12, %c0_13] : memref<48x128xf32, #tpu.memory_space<vmem>>, vector<48x128xf32>
      tpu.vector_store %arg6[%c0_12, %c0_13], %14 {strides = array<i32>} : memref<48x128xf32, #tpu.memory_space<vmem>>, vector<48x128xf32>,
    } else {
    }
    %c0 = arith.constant 0 : index
    %c0_1 = arith.constant 0 : index
    %3 = vector.load %arg6[%c0, %c0_1] : memref<48x128xf32, #tpu.memory_space<vmem>>, vector<48x128xf32>
    %c0_2 = arith.constant 0 : index
    %c0_3 = arith.constant 0 : index
    %c0_4 = arith.constant 0 : index
    %4 = vector.load %arg2[%c0_2, %c0_3, %c0_4] : memref<1x48x32xf32, #tpu.memory_space<vmem>>, vector<1x48x32xf32>
    %5 = vector.shape_cast %4 : vector<1x48x32xf32> to vector<48x32xf32>
    %c0_5 = arith.constant 0 : index
    %c0_6 = arith.constant 0 : index
    %c0_7 = arith.constant 0 : index
    %6 = vector.load %arg3[%c0_5, %c0_6, %c0_7] : memref<1x32x128xf32, #tpu.memory_space<vmem>>, vector<1x32x128xf32>
    %7 = vector.shape_cast %6 : vector<1x32x128xf32> to vector<32x128xf32>
    %cst = arith.constant dense<0.000000e+00> : vector<48x128xf32>
    %8 = tpu.matmul %5, %7, %cst {dimension_numbers = #tpu.dot_dimension_numbers<[1], [0], [0], [1], [0, 0, 1, 1], [], []>} : vector<48x32xf32>, vector<32x128xf32>, vector<48x128xf32> -> vector<48x128xf32>
    %9 = arith.addf %3, %8 : vector<48x128xf32>
    %c0_8 = arith.constant 0 : index
    %c0_9 = arith.constant 0 : index
    %10 = vector.load %arg6[%c0_8, %c0_9] : memref<48x128xf32, #tpu.memory_space<vmem>>, vector<48x128xf32>
    tpu.vector_store %arg6[%c0_8, %c0_9], %9 {strides = array<i32>} : memref<48x128xf32, #tpu.memory_space<vmem>>, vector<48x128xf32>,
    %c3_i32 = arith.constant 3 : i32
    %11 = arith.cmpi eq, %arg1, %c3_i32 : i32
    %12 = arith.extui %11 : i1 to i32
    %c0_i32_10 = arith.constant 0 : i32
    %13 = arith.cmpi ne, %12, %c0_i32_10 : i32
    scf.if %13 {
      %c0_11 = arith.constant 0 : index
      %c0_12 = arith.constant 0 : index
      %14 = vector.load %arg6[%c0_11, %c0_12] : memref<48x128xf32, #tpu.memory_space<vmem>>, vector<48x128xf32>
      %cst_13 = arith.constant 2.500000e-01 : f32
      %15 = vector.broadcast %cst_13 : f32 to vector<48x128xf32>
      %16 = arith.mulf %14, %15 : vector<48x128xf32>
      %c0_14 = arith.constant 0 : index
      %c0_15 = arith.constant 0 : index
      %17 = vector.load %arg4[%c0_14, %c0_15] : memref<1x128xf32, #tpu.memory_space<vmem>>, vector<1x128xf32>
      %18 = vector.broadcast %17 : vector<1x128xf32> to vector<48x128xf32>
      %19 = arith.addf %16, %18 : vector<48x128xf32>
      %c0_16 = arith.constant 0 : index
      %c0_17 = arith.constant 0 : index
      %20 = vector.load %arg5[%c0_16, %c0_17] : memref<48x128xf32, #tpu.memory_space<vmem>>, vector<48x128xf32>
      tpu.vector_store %arg5[%c0_16, %c0_17], %19 {strides = array<i32>} : memref<48x128xf32, #tpu.memory_space<vmem>>, vector<48x128xf32>,
    } else {
    }
    return
  }
  func.func @transform_0(%arg0: i32, %arg1: i32) -> (i32, i32, i32) {
    %c0_i32 = arith.constant 0 : i32
    %c0_i32_0 = arith.constant 0 : i32
    return %arg1, %arg0, %c0_i32 : i32, i32, i32
  }
  func.func @transform_1(%arg0: i32, %arg1: i32) -> (i32, i32, i32) {
    %c0_i32 = arith.constant 0 : i32
    %c0_i32_0 = arith.constant 0 : i32
    %c0_i32_1 = arith.constant 0 : i32
    return %arg1, %c0_i32, %c0_i32_0 : i32, i32, i32
  }
  func.func @transform_2(%arg0: i32, %arg1: i32) -> (i32, i32) {
    %c0_i32 = arith.constant 0 : i32
    %c0_i32_0 = arith.constant 0 : i32
    %c0_i32_1 = arith.constant 0 : i32
    return %c0_i32, %c0_i32_0 : i32, i32
  }
  func.func @transform_3(%arg0: i32, %arg1: i32) -> (i32, i32) {
    %c0_i32 = arith.constant 0 : i32
    %c0_i32_0 = arith.constant 0 : i32
    return %arg0, %c0_i32 : i32, i32
  }
}

</mosaic_0001>

<bundles_post_ra>
// kernel: tpu_custom_call.1
= control target key start
LH: loop header
LB: loop body
LE: loop exit
PB: predicated region body
PF: predicated region fallthrough
CT: control target
= control target key end

     0   :  { %8 = vsyncpa [#allocation4], 0  ;;  %s831_s0 = inlined_call_operand.vmem [shape: f32[4,96,32], index: 0, kind: input, shape index: {}]   ;;  %s832_s1 = inlined_call_operand.vmem [shape: f32[4,32,128], index: 1, kind: input, shape index: {}]   ;;  %s833_s2 = inlined_call_operand.vmem [shape: f32[1,128], index: 2, kind: input, shape index: {}]   ;;  %s834_s3 = inlined_call_operand.hbm [shape: f32[96,128], index: 3, kind: output, shape index: {}]  }
   0x1   :  { %10 = vsyncpa [#allocation4 + $0x1], 0  ;;  %s678_s12 = smov 0   ;;  %s680_s13 = smov 0  }
   0x2   :  { %s682_s14 = smov 0   ;;  %s684_s15 = smov 0  }
   0x3   :  { %s686_s16 = smov 0   ;;  %s688_s17 = smov 0  }
   0x4   :  { %s690_s18 = smov 0   ;;  %s692_s19 = smov 0  }
   0x5 LB: > { %s449_s20 = sadd.s32 4294967295, %s653_s19   ;;  %s450_s21 = sadd.s32 4294967294, %s653_s19   ;;  %s653_s19 = sphi %s692_s19, %s16_s19   ;;  %s649_s18 = sphi %s690_s18, %s846_s18   ;;  %s645_s17 = sphi %s688_s17, %s845_s17   ;;  %s641_s16 = sphi %s686_s16, %s844_s16   ;;  %s637_s15 = sphi %s684_s15, %s843_s15   ;;  %s633_s14 = sphi %s682_s14, %s842_s14   ;;  %s629_s13 = sphi %s680_s13, %s841_s13   ;;  %s625_s12 = sphi %s678_s12, %s840_s12  }
   0x6   : > { %s25_s22 = sadd.s32 1, %s645_s17  ;;  %s28_s23 = sadd.s32 1, %s649_s18 }
   0x7   : > { %p26_p0 = scmp.ge.s32.totalorder %s25_s22, 4  ;;  %p120_p1 = scmp.ne.s32.totalorder %s633_s14, %s629_s13 }
   0x8   : > { %p121_p2 = scmp.eq.s32.totalorder %s449_s20, 7  ;;  %p126_p4 = scmp.ne.s32.totalorder %s629_s13, %s625_s12 }
   0x9   : > { %s848_s22 = smov (%p26_p0, %s25_s22), 0  ;;  %s850_s23 = smov (!%p26_p0, %s28_s23), %s649_s18 }
   0xa   : > { %p727_p3 = por %p121_p2, %p120_p1  ;;  %p30_p5 = scmp.ge.s32.totalorder %s850_s23, 2 }
   0xb   : > { %p127_p6 = scmp.eq.s32.totalorder %s450_s21, 7  ;;  %p453_p7 = scmp.ge.s32.totalorder %s653_s19, 1 }
   0xc   : > { %p169_p8 = scmp.lt.s32.totalorder %s653_s19, 9  ;;  %s852_s23 = smov (%p30_p5, %s850_s23), 0 }
   0xd   : > { %837 = sst [smem:[#allocation6_spill]] %s852_s23  ;;  %p737_p9 = por %p127_p6, %p126_p4 }
   0xe   : > { %p170_p10 = pnand %p453_p7, %p169_p8  ;;  %s107_s26 = ssub.s32 %s649_s18, %s852_s23 }
   0xf   : > { %s110_s27 = sadd.s32 1, %s633_s14  ;;  %p108_p11 = scmp.eq.s32.totalorder %s107_s26, 0 }
  0x10   : > { %173 = sbr.rel (%p170_p10) target bundleno = 216 (0xd8), region = 32  ;;  %s199_s29 = sand.u32 (!%p170_p10), 1, %s629_s13  }
  0x11   : > { %s745_s28 = scalar_select %p108_p11, %s633_s14, %s110_s27  }
  0x12   : > { %s202_s30 = smul.u32 (!%p170_p10), 6, %s641_s16  ;;  %p203_p12 = scmp.lt.s32.totalorder (!%p170_p10), %s637_s15, 3 }
  0x13   : > { %s482_s4 = smul.u32 (!%p170_p10), 48, %s199_s29  ;;  %p457_p0 = scmp.ne.s32.totalorder (!%p170_p10), %s637_s15, 0 }
  0x14   : > { %p205_p13 = scmp.lt.s32.totalorder (!%p170_p10), %s202_s30, 11 }
  0x15   : > { %s204_s5 = scalar_select %p203_p12, %s637_s15, 3 }
  0x16   : > { %s854_s30 = smov (!%p205_p13, %s202_s30), 11  ;;  %s761_s23 = scalar_lea.vmem [#allocation3], %s482_s4 }
  0x17   : > { %s483_s6 = smul.u32 12, %s204_s5  ;;  %s468_s7 = sshll.u32 %s204_s5, 5 }
  0x18   : > { %s216_s10 = scalar_lea.vmem %s832_s1, %s468_s7  ;;  %221 = sbr.rel (%p457_p0) target bundleno = 36 (0x24), region = 36 }
  0x19   : > { %s208_s11 = sadd.s32 %s483_s6, %s854_s30 }
  0x1a   : > { %s454_s20 = sshll.u32 %s208_s11, 3 }
  0x1b   : > { %s759_s27 = scalar_lea.vmem %s831_s0, %s454_s20 }
  0x1d   : > { %v655_v0 = vmov 0.0  }
  0x1e   : > { %222 = vst [vmem:[#allocation2 + $0x28] sm:$0xff] %v655_v0 }
  0x1f   : > { %223 = vst [vmem:[#allocation2 + $0x10] sm:$0xff] %v655_v0 }
  0x20   : > { %224 = vst [vmem:[#allocation2 + $0x8] sm:$0xff] %v655_v0 }
  0x21   : > { %225 = vst [vmem:[#allocation2] sm:$0xff] %v655_v0 }
  0x22   : > { %226 = vst [vmem:[#allocation2 + $0x18] sm:$0xff] %v655_v0 }
  0x23   : > { %227 = vst [vmem:[#allocation2 + $0x20] sm:$0xff] %v655_v0 }
  0x24 PF: > { %v243_v1 = vld [vmem:[%s216_s10 + $0x18] sm:$0xff]  ;;  %v242_v2 = vld [vmem:[%s216_s10 + $0x10] sm:$0xff]  ;;  %v241_v3 = vld [vmem:[%s216_s10 + $0x8] sm:$0xff]  ;;  %vm244_vm0 = vcmask 261120   ;;  %p464_p1 = scmp.ne.s32.totalorder %s637_s15, 3 }
  0x25   : > { %472 = vmatpush.msra.mxu3 %v243_v1  ;;  %470 = vmatpush.msra.mxu1 %v243_v1  ;;  %v240_v4 = vld [vmem:[%s216_s10] sm:$0xff]  ;;  %v235_v6 = vld [vmem:[%s759_s27 + $0x8] sm:$0xff]  ;;  %v237_v7 = vld [vmem:[%s759_s27 + $0x18] sm:$0xff] }
  0x26   : > { %471 = vmatpush.msra.mxu2 %v243_v1  ;;  %275 = vmatpush.msra.mxu0 %v243_v1  ;;  %v238_v5 = vld [vmem:[%s759_s27 + $0x20] sm:$0xff]  ;;  %v239_v9 = vld [vmem:[%s759_s27 + $0x28] sm:$0xff]  ;;  %v236_v10 = vld [vmem:[%s759_s27 + $0x10] sm:$0xff] }
  0x27   : > { %475 = vmatpush.msra.mxu3 %v242_v2  ;;  %473 = vmatpush.msra.mxu1 %v242_v2  ;;  %v234_v8 = vld [vmem:[%s759_s27] sm:$0xff]  ;;  %v229_v11 = vld [vmem:[#allocation2 + $0x10] sm:$0xff]  ;;  %v228_v13 = vld [vmem:[#allocation2 + $0x28] sm:$0xff] }
  0x28   : > { %474 = vmatpush.msra.mxu2 %v242_v2  ;;  %276 = vmatpush.msra.mxu0 %v242_v2  ;;  %v230_v19 = vld [vmem:[#allocation2 + $0x8] sm:$0xff]  ;;  %v231_v20 = vld [vmem:[#allocation2] sm:$0xff] }
  0x29   : > { %478 = vmatpush.msra.mxu3 %v241_v3  ;;  %476 = vmatpush.msra.mxu1 %v241_v3  ;;  %v232_v17 = vld [vmem:[#allocation2 + $0x18] sm:$0xff] }
  0x2a   : > { %477 = vmatpush.msra.mxu2 %v241_v3  ;;  %277 = vmatpush.msra.mxu0 %v241_v3  ;;  %v233_v26 = vld [vmem:[#allocation2 + $0x20] sm:$0xff] }
  0x2b   : > { %481 = vmatpush.msra.mxu3 %v240_v4  ;;  %479 = vmatpush.msra.mxu1 %v240_v4 }
  0x2c   : > { %462 = vmatmul.msk.f32.vlgmr.msra.gmra.mxu3 %vm244_vm0, %v238_v5  ;;  %459 = vmatmul.msk.f32.vlgmr.msra.gmra.mxu1 %vm244_vm0, %v235_v6 }
  0x2d   : > { %480 = vmatpush.msra.mxu2 %v240_v4  ;;  %278 = vmatpush.msra.mxu0 %v240_v4 }
  0x2e   : > { %461 = vmatmul.msk.f32.vlgmr.msra.gmra.mxu2 %vm244_vm0, %v237_v7  ;;  %458 = vmatmul.msk.f32.vlgmr.msra.gmra.mxu0 %vm244_vm0, %v234_v8 }
  0x34   : > { %463 = vmatmul.msk.f32.gmra.mxu3 %vm244_vm0, %v239_v9  ;;  %460 = vmatmul.msk.f32.gmra.mxu1 %vm244_vm0, %v236_v10 }
  0xa9   : > { %v283_v12 = vpop.f32.mrf.mxu1 }
  0xaa   : > { %v299_v14 = vadd.f32 %v283_v12, %v229_v11 }
  0xab   : > { %v280_v15 = vpop.f32.mrf.mxu0 }
  0xac   : > { %305 = vst [vmem:[#allocation2 + $0x10] sm:$0xff] %v299_v14  ;;  %v298_v16 = vadd.f32 %v280_v15, %v228_v13 }
  0xae   : > { %304 = vst [vmem:[#allocation2 + $0x28] sm:$0xff] %v298_v16 }
  0xaf   : > { %v292_v18 = vpop.f32.mrf.mxu3 }
  0xb0   : > { %v302_v21 = vadd.f32 %v292_v18, %v232_v17 }
  0xb1   : > { %v286_v22 = vpop.f32.mrf.mxu1  ;;  %v289_v23 = vpop.f32.mrf.mxu2 }
  0xb2   : > { %308 = vst [vmem:[#allocation2 + $0x18] sm:$0xff] %v302_v21  ;;  %v300_v24 = vadd.f32 %v286_v22, %v230_v19  ;;  %v301_v25 = vadd.f32 %v289_v23, %v231_v20 }
  0xb4   : > { %306 = vst [vmem:[#allocation2 + $0x8] sm:$0xff] %v300_v24 }
  0xb5   : > { %307 = vst [vmem:[#allocation2] sm:$0xff] %v301_v25 }
  0xb6   : > { %313 = sbr.rel (%p464_p1) target bundleno = 199 (0xc7), region = 40 }
  0xb7   : > { %v295_v27 = vpop.f32.mrf.mxu3 }
  0xb8   : > { %v303_v28 = vadd.f32 %v295_v27, %v233_v26 }
  0xba   : > { %309 = vst [vmem:[#allocation2 + $0x20] sm:$0xff] %v303_v28 }
  0xbb   : > { %v314_v29 = vld [vmem:[#allocation2 + $0x28] sm:$0xff]  ;;  %v558_v30 = vld [vmem:[%s833_s2] ss:$0 sm:$0xff]  ;;  %v315_v32 = vld [vmem:[#allocation2 + $0x10] sm:$0xff] }
  0xbc   : > { %v320_v31 = vmul.f32 0.25, %v314_v29  ;;  %v316_v33 = vld [vmem:[#allocation2 + $0x8] sm:$0xff]  ;;  %v317_v34 = vld [vmem:[#allocation2] sm:$0xff]  ;;  %v321_v35 = vmul.f32 0.25, %v315_v32  ;;  %v318_v38 = vld [vmem:[#allocation2 + $0x18] sm:$0xff] }
  0xbd   : > { %v322_v36 = vmul.f32 0.25, %v316_v33  ;;  %v323_v37 = vmul.f32 0.25, %v317_v34  ;;  %v324_v41 = vmul.f32 0.25, %v318_v38 }
  0xbe   : > { %v330_v40 = vadd.f32 %v558_v30, %v320_v31  ;;  %v331_v43 = vadd.f32 %v558_v30, %v321_v35 }
  0xbf   : > { %v332_v44 = vadd.f32 %v558_v30, %v322_v36  ;;  %v333_v45 = vadd.f32 %v558_v30, %v323_v37  ;;  %v334_v46 = vadd.f32 %v558_v30, %v324_v41 }
  0xc0   : > { %336 = vst [vmem:[%s761_s23] sm:$0xff] %v330_v40 }
  0xc1   : > { %v319_v39 = vld [vmem:[#allocation2 + $0x20] sm:$0xff]  ;;  %337 = vst [vmem:[%s761_s23 + $0x8] sm:$0xff] %v331_v43 }
  0xc2   : > { %v325_v42 = vmul.f32 0.25, %v319_v39  ;;  %338 = vst [vmem:[%s761_s23 + $0x10] sm:$0xff] %v332_v44 }
  0xc3   : > { %339 = vst [vmem:[%s761_s23 + $0x18] sm:$0xff] %v333_v45 }
  0xc4   : > { %v335_v47 = vadd.f32 %v558_v30, %v325_v42  ;;  %340 = vst [vmem:[%s761_s23 + $0x20] sm:$0xff] %v334_v46 }
  0xc6   : > { %341 = vst [vmem:[%s761_s23 + $0x28] sm:$0xff] %v335_v47 }
  0xc7 PF: > { %s469_s15 = smul.u32 48, %s641_s16  ;;  %s355_s5 = sshll.u32 %s761_s23, 4  ;;  %s356_s5 = int_to_ptr.vmem [resolvable:$true] %s355_s5 }
  0xc8   : > { %s343_s10 = scalar_lea.sflag [#allocation4], %s199_s29  ;;  %s579_s16 = scalar_lea.hbm %s834_s3, 96 }
  0xc9   : > { %s354_s8 = scalar_lea.hbm %s834_s3, %s469_s15 }
  0xca   : > { %s357_s9 = sshll.u32 %s354_s8, 4  ;;  %s358_s9 = int_to_ptr.hbm [resolvable:$true] %s357_s9 }
  0xcb   : > { %s573_s11 = sshra.s32 %s358_s9, 4  ;;  %s574_s11 = int_to_ptr.hbm [resolvable:$true] %s573_s11 }
  0xcc   : > { %s575_s20 = scalar_lea.hbm %s574_s11, 48  ;;  %p580_p6 = scmp.lt.s32.totalorder %s574_s11, %s834_s3 }
  0xcd   : > { %p576_p2 = scmp.ne.s32.totalorder %s574_s11, %s575_s20  ;;  %p581_p7 = scmp.lt.s32.totalorder %s579_s16, %s575_s20 }
  0xcf   : > { %p577_p4 = pnand %p576_p2, %p727_p3  ;;  %p582_p8 = por %p581_p7, %p580_p6 }
  0xd1   : > { %p578_p5 = pneg %p577_p4 }
  0xd3   : > { %p583_p10 = pnand %p582_p8, %p578_p5 }
  0xd5   : > { %586 = shalt.err (!%p583_p10)
}
  0xd6   : > { %s656_s29 = smov 128   ;;  %s657_s30 = smov 8  }
  0xd7   : > { %484 = dma.vmem_to_hbm [thread:$0]  (%p727_p3), %s356_s5, 768, %s358_s9, %s343_s10, %s656_s29, %s656_s29, %s657_s30  }
  0xd8 PF: > { %p490_p11 = scmp.ge.s32.totalorder %s653_s19, 2  ;;  %s372_s4 = sand.u32 1, %s625_s12  }
  0xd9   : > { %s373_s15 = scalar_lea.sflag [#allocation4], %s372_s4 }
  0xda   : > { %p487_p12 = pnand %p490_p11, %p737_p9 }
  0xdc   : > { %p488_p13 = pneg %p487_p12 }
  0xde   : > { %620 = dma.done.wait (%p488_p13), %s373_s15, 768  }
  0xdf   : > { %622 = vsyncadd (%p488_p13), %s373_s15, 4294966528  ;;  %s16_s19 = sadd.s32 1, %s653_s19   ;;  %s839_s24 = sld [smem:[#allocation6_spill]] }
  0xe0   : > { %p13_p0 = scmp.ge.s32.totalorder %s16_s19, 10   ;;  %s840_s12 = smov %s629_s13 }
  0xe1   : > { %s841_s13 = smov %s633_s14  ;;  %s842_s14 = smov %s745_s28 }
  0xe2   : > { %s843_s15 = smov %s645_s17  ;;  %s844_s16 = smov %s649_s18 }
  0xe3   : > { %s845_s17 = smov %s848_s22  ;;  %15 = sbr.rel (!%p13_p0) target bundleno = 5 (0x5), region = 78 }
  0xe5   : > { %s846_s18 = smov %s839_s24 }
  0xe8   :  { %379 = vsyncpa [#allocation4], 1 }
  0xe9   :  { %381 = vsyncpa [#allocation4 + $0x1], 1 }

</bundles_post_ra>
